<compile_context>
chip_gen: v5e
topology: v5e:2x2
jax: 0.10.0
libtpu: 0.0.40
codegen_flags: <defaults>
</compile_context>

<pallas_src>
import functools
import math

import jax
import jax.numpy as jnp
from jax.experimental import pallas as pl
from jax.experimental.pallas import tpu as pltpu

LANES = 128
SUBLANES = 8


def _hematoma_kernel(data_ref, label_ref, pred_ref, out_ref,
                     inter_acc, p2_acc, l2_acc,
                     *, thr, smooth, tr, rows_valid, need_row_mask):
    t = pl.program_id(1)

    @pl.when(t == 0)
    def _():
        inter_acc[...] = jnp.zeros_like(inter_acc)
        p2_acc[...] = jnp.zeros_like(p2_acc)
        l2_acc[...] = jnp.zeros_like(l2_acc)

    # Native-dtype loads; upcast to f32 in-register (math is f32 on all gens).
    data = data_ref[0].astype(jnp.float32)     # (TR, 128)
    pred = pred_ref[0].astype(jnp.float32)     # (TR, 128)
    label = label_ref[0]                       # compared in native dtype

    mask = (label == 1) & (data > jnp.float32(thr))
    if need_row_mask:
        # Last grid step reads a partial (OOB-padded) block: kill garbage rows.
        rows = jax.lax.broadcasted_iota(jnp.int32, (tr, LANES), 0) + t * tr
        mask = mask & (rows < rows_valid)

    # mask implies label == 1, so fl == mask_f, fl*fl == mask_f, fp*fl == fp.
    mask_f = mask.astype(jnp.float32)
    fp = jnp.where(mask, pred, jnp.float32(0.0))   # select (NaN-safe for OOB pad)

    # Fold each (TR,128) tile to a single (8,128) vreg with pure VPU adds.
    def fold(x):
        return x.reshape(tr // SUBLANES, SUBLANES, LANES).sum(axis=0)

    inter_acc[...] += fold(fp)
    p2_acc[...] += fold(fp * fp)
    l2_acc[...] += fold(mask_f)

    @pl.when(t == pl.num_programs(1) - 1)
    def _():
        inter = jnp.sum(inter_acc[...])
        denom = jnp.sum(p2_acc[...]) + jnp.sum(l2_acc[...]) + jnp.float32(smooth)
        dice = (jnp.float32(2.0) * inter + jnp.float32(smooth)) / denom
        out_ref[...] = jnp.full(out_ref.shape, jnp.float32(1.0) - dice,
                                dtype=jnp.float32)


def hematoma_loss(data, label, prediction, he_threshold=40, tile_rows=2048):
    """data/label/prediction: (B, C, H, W). Returns scalar mean (1 - dice)."""
    assert data.shape == label.shape == prediction.shape
    B = data.shape[0]
    N = math.prod(data.shape[1:])
    thr = (he_threshold / 80.0 - 0.5) / 0.5

    # Lane-dense layout: (B, N) -> (B, R0, 128).  Metadata-only when N % 128
    # == 0; otherwise pad just the <128-element ragged tail (label pad = 0).
    R0 = pl.cdiv(N, LANES)
    pad_cols = R0 * LANES - N

    def _prep(x):
        x = x.reshape(B, N)
        if pad_cols:
            x = jnp.pad(x, ((0, 0), (0, pad_cols)))
        return x.reshape(B, R0, LANES)

    data_p, label_p, pred_p = _prep(data), _prep(label), _prep(prediction)

    # Row tile: multiple of 8, no larger than the (rounded-up) row count.
    tile_rows = max(SUBLANES, (tile_rows // SUBLANES) * SUBLANES)
    tr = min(tile_rows, ((R0 + SUBLANES - 1) // SUBLANES) * SUBLANES)
    num_tiles = pl.cdiv(R0, tr)
    need_row_mask = (R0 % tr) != 0

    kernel = functools.partial(
        _hematoma_kernel, thr=thr, smooth=1.0, tr=tr,
        rows_valid=R0, need_row_mask=need_row_mask)

    in_block = pl.BlockSpec((1, tr, LANES), lambda b, t: (b, t, 0))

    # Explicit scoped-VMEM budget: 3 double-buffered input blocks (native
    # dtype) + three (8,128) f32 accumulators + headroom, capped at 32 MiB.
    in_bytes = sum(jnp.dtype(x.dtype).itemsize for x in (data, label, prediction))
    working_set = 2 * tr * LANES * in_bytes + 3 * SUBLANES * LANES * 4 + 2 * LANES * 4
    vmem_limit = int(min(32 << 20, max(working_set + (4 << 20), 8 << 20)))

    out = pl.pallas_call(
        kernel,
        out_shape=jax.ShapeDtypeStruct((B, 1, LANES), jnp.float32),
        grid=(B, num_tiles),
        in_specs=[in_block, in_block, in_block],
        out_specs=pl.BlockSpec((1, 1, LANES), lambda b, t: (b, 0, 0)),
        scratch_shapes=[pltpu.VMEM((SUBLANES, LANES), jnp.float32)] * 3,
        compiler_params=pltpu.CompilerParams(
            dimension_semantics=("parallel", "arbitrary"),
            vmem_limit_bytes=vmem_limit),
    )(data_p, label_p, pred_p)

    per_sample = out[:, 0, 0]          # (B,) = 1 - dice per sample
    return jnp.mean(per_sample)


def _reference(data, label, prediction, he_threshold=40):
    thr = (he_threshold / 80.0 - 0.5) / 0.5
    data = data.astype(jnp.float32)
    label = label.astype(jnp.float32)
    prediction = prediction.astype(jnp.float32)
    hematoma = ((label == 1) & (data > thr)).astype(jnp.float32)
    fl = label * hematoma
    fp = prediction * hematoma
    smooth = 1.0
    axes = tuple(range(1, data.ndim))
    dice = (2.0 * jnp.sum(fp * fl, axis=axes) + smooth) / (
        jnp.sum(fp ** 2, axis=axes) + jnp.sum(fl ** 2, axis=axes) + smooth)
    return jnp.mean(1.0 - dice)


if __name__ == "__main__":
    key = jax.random.PRNGKey(0)
    k1, k2, k3 = jax.random.split(key, 3)

    B, C, H, W = 2, 4, 16, 16
    data = jax.random.normal(k1, (B, C, H, W), dtype=jnp.float32)            # normalized image
    label = jax.random.randint(k2, (B, C, H, W), 0, 3).astype(jnp.float32)   # {0,1,2} labels
    prediction = jax.nn.sigmoid(
        jax.random.normal(k3, (B, C, H, W), dtype=jnp.float32))              # probabilities

    loss = hematoma_loss(data, label, prediction)
    loss = jax.block_until_ready(loss)

    ref = _reference(data, label, prediction)
    assert jnp.allclose(loss, ref, rtol=1e-5, atol=1e-6), (loss, ref)

    print("KERNEL_OK")
</pallas_src>

<mosaic_0001>
module attributes {stable_mosaic.version = 11 : i64} {
  func.func @_hematoma_kernel(%arg0: i32, %arg1: i32, %arg2: memref<1x8x128xf32, #tpu.memory_space<vmem>>, %arg3: memref<1x8x128xf32, #tpu.memory_space<vmem>>, %arg4: memref<1x8x128xf32, #tpu.memory_space<vmem>>, %arg5: memref<1x1x128xf32, #tpu.memory_space<vmem>>, %arg6: memref<8x128xf32, #tpu.memory_space<vmem>>, %arg7: memref<8x128xf32, #tpu.memory_space<vmem>>, %arg8: memref<8x128xf32, #tpu.memory_space<vmem>>) attributes {dimension_semantics = [#tpu.dimension_semantics<parallel>, #tpu.dimension_semantics<arbitrary>], iteration_bounds = array<i64: 2, 1>, scalar_prefetch = 0 : i64, scratch_operands = 3 : i64, tpu.core_type = #tpu.core_type<tc>, window_params = [{transform_indices = @transform_0, window_bounds = array<i64: 1, 8, 128>}, {transform_indices = @transform_1, window_bounds = array<i64: 1, 8, 128>}, {transform_indices = @transform_2, window_bounds = array<i64: 1, 8, 128>}, {transform_indices = @transform_3, window_bounds = array<i64: 1, 1, 128>}]} {
    %c0_i32 = arith.constant 0 : i32
    %0 = arith.cmpi eq, %arg1, %c0_i32 : i32
    %1 = arith.extui %0 : i1 to i32
    %c0_i32_0 = arith.constant 0 : i32
    %2 = arith.cmpi ne, %1, %c0_i32_0 : i32
    scf.if %2 {
      %cst_28 = arith.constant 0.000000e+00 : f32
      %37 = vector.broadcast %cst_28 : f32 to vector<8x128xf32>
      %c0_29 = arith.constant 0 : index
      %c0_30 = arith.constant 0 : index
      %38 = vector.load %arg6[%c0_29, %c0_30] : memref<8x128xf32, #tpu.memory_space<vmem>>, vector<8x128xf32>
      tpu.vector_store %arg6[%c0_29, %c0_30], %37 {strides = array<i32>} : memref<8x128xf32, #tpu.memory_space<vmem>>, vector<8x128xf32>,
      %cst_31 = arith.constant 0.000000e+00 : f32
      %39 = vector.broadcast %cst_31 : f32 to vector<8x128xf32>
      %c0_32 = arith.constant 0 : index
      %c0_33 = arith.constant 0 : index
      %40 = vector.load %arg7[%c0_32, %c0_33] : memref<8x128xf32, #tpu.memory_space<vmem>>, vector<8x128xf32>
      tpu.vector_store %arg7[%c0_32, %c0_33], %39 {strides = array<i32>} : memref<8x128xf32, #tpu.memory_space<vmem>>, vector<8x128xf32>,
      %cst_34 = arith.constant 0.000000e+00 : f32
      %41 = vector.broadcast %cst_34 : f32 to vector<8x128xf32>
      %c0_35 = arith.constant 0 : index
      %c0_36 = arith.constant 0 : index
      %42 = vector.load %arg8[%c0_35, %c0_36] : memref<8x128xf32, #tpu.memory_space<vmem>>, vector<8x128xf32>
      tpu.vector_store %arg8[%c0_35, %c0_36], %41 {strides = array<i32>} : memref<8x128xf32, #tpu.memory_space<vmem>>, vector<8x128xf32>,
    } else {
    }
    %c0 = arith.constant 0 : index
    %c0_1 = arith.constant 0 : index
    %c0_2 = arith.constant 0 : index
    %3 = vector.load %arg2[%c0, %c0_1, %c0_2] : memref<1x8x128xf32, #tpu.memory_space<vmem>>, vector<1x8x128xf32>
    %4 = vector.shape_cast %3 : vector<1x8x128xf32> to vector<8x128xf32>
    %c0_3 = arith.constant 0 : index
    %c0_4 = arith.constant 0 : index
    %c0_5 = arith.constant 0 : index
    %5 = vector.load %arg4[%c0_3, %c0_4, %c0_5] : memref<1x8x128xf32, #tpu.memory_space<vmem>>, vector<1x8x128xf32>
    %6 = vector.shape_cast %5 : vector<1x8x128xf32> to vector<8x128xf32>
    %c0_6 = arith.constant 0 : index
    %c0_7 = arith.constant 0 : index
    %c0_8 = arith.constant 0 : index
    %7 = vector.load %arg3[%c0_6, %c0_7, %c0_8] : memref<1x8x128xf32, #tpu.memory_space<vmem>>, vector<1x8x128xf32>
    %8 = vector.shape_cast %7 : vector<1x8x128xf32> to vector<8x128xf32>
    %cst = arith.constant 1.000000e+00 : f32
    %9 = vector.broadcast %cst : f32 to vector<8x128xf32>
    %10 = arith.cmpf oeq, %8, %9 : vector<8x128xf32>
    %cst_9 = arith.constant 0.000000e+00 : f32
    %11 = vector.broadcast %cst_9 : f32 to vector<8x128xf32>
    %12 = arith.cmpf ogt, %4, %11 : vector<8x128xf32>
    %13 = arith.andi %10, %12 : vector<8x128xi1>
    %14 = arith.extui %13 : vector<8x128xi1> to vector<8x128xi32>
    %15 = arith.sitofp %14 : vector<8x128xi32> to vector<8x128xf32>
    %cst_10 = arith.constant 0.000000e+00 : f32
    %16 = vector.broadcast %cst_10 : f32 to vector<8x128xf32>
    %17 = arith.select %13, %6, %16 : vector<8x128xi1>, vector<8x128xf32>
    %c0_11 = arith.constant 0 : index
    %c0_12 = arith.constant 0 : index
    %18 = vector.load %arg6[%c0_11, %c0_12] : memref<8x128xf32, #tpu.memory_space<vmem>>, vector<8x128xf32>
    %19 = vector.shape_cast %17 : vector<8x128xf32> to vector<1x8x128xf32>
    %cst_13 = arith.constant dense<0.000000e+00> : vector<8x128xf32>
    %20 = vector.multi_reduction <add>, %19, %cst_13 [0] : vector<1x8x128xf32> to vector<8x128xf32>
    %21 = arith.addf %18, %20 : vector<8x128xf32>
    %c0_14 = arith.constant 0 : index
    %c0_15 = arith.constant 0 : index
    %22 = vector.load %arg6[%c0_14, %c0_15] : memref<8x128xf32, #tpu.memory_space<vmem>>, vector<8x128xf32>
    tpu.vector_store %arg6[%c0_14, %c0_15], %21 {strides = array<i32>} : memref<8x128xf32, #tpu.memory_space<vmem>>, vector<8x128xf32>,
    %c0_16 = arith.constant 0 : index
    %c0_17 = arith.constant 0 : index
    %23 = vector.load %arg7[%c0_16, %c0_17] : memref<8x128xf32, #tpu.memory_space<vmem>>, vector<8x128xf32>
    %24 = arith.mulf %17, %17 : vector<8x128xf32>
    %25 = vector.shape_cast %24 : vector<8x128xf32> to vector<1x8x128xf32>
    %cst_18 = arith.constant dense<0.000000e+00> : vector<8x128xf32>
    %26 = vector.multi_reduction <add>, %25, %cst_18 [0] : vector<1x8x128xf32> to vector<8x128xf32>
    %27 = arith.addf %23, %26 : vector<8x128xf32>
    %c0_19 = arith.constant 0 : index
    %c0_20 = arith.constant 0 : index
    %28 = vector.load %arg7[%c0_19, %c0_20] : memref<8x128xf32, #tpu.memory_space<vmem>>, vector<8x128xf32>
    tpu.vector_store %arg7[%c0_19, %c0_20], %27 {strides = array<i32>} : memref<8x128xf32, #tpu.memory_space<vmem>>, vector<8x128xf32>,
    %c0_21 = arith.constant 0 : index
    %c0_22 = arith.constant 0 : index
    %29 = vector.load %arg8[%c0_21, %c0_22] : memref<8x128xf32, #tpu.memory_space<vmem>>, vector<8x128xf32>
    %30 = vector.shape_cast %15 : vector<8x128xf32> to vector<1x8x128xf32>
    %cst_23 = arith.constant dense<0.000000e+00> : vector<8x128xf32>
    %31 = vector.multi_reduction <add>, %30, %cst_23 [0] : vector<1x8x128xf32> to vector<8x128xf32>
    %32 = arith.addf %29, %31 : vector<8x128xf32>
    %c0_24 = arith.constant 0 : index
    %c0_25 = arith.constant 0 : index
    %33 = vector.load %arg8[%c0_24, %c0_25] : memref<8x128xf32, #tpu.memory_space<vmem>>, vector<8x128xf32>
    tpu.vector_store %arg8[%c0_24, %c0_25], %32 {strides = array<i32>} : memref<8x128xf32, #tpu.memory_space<vmem>>, vector<8x128xf32>,
    %c0_i32_26 = arith.constant 0 : i32
    %34 = arith.cmpi eq, %arg1, %c0_i32_26 : i32
    %35 = arith.extui %34 : i1 to i32
    %c0_i32_27 = arith.constant 0 : i32
    %36 = arith.cmpi ne, %35, %c0_i32_27 : i32
    scf.if %36 {
      %c0_28 = arith.constant 0 : index
      %c0_29 = arith.constant 0 : index
      %37 = vector.load %arg6[%c0_28, %c0_29] : memref<8x128xf32, #tpu.memory_space<vmem>>, vector<8x128xf32>
      %38 = vector.shape_cast %37 : vector<8x128xf32> to vector<1x8x128xf32>
      %cst_30 = arith.constant dense<0.000000e+00> : vector<1xf32>
      %39 = vector.multi_reduction <add>, %38, %cst_30 [1, 2] : vector<1x8x128xf32> to vector<1xf32>
      %40 = vector.shape_cast %39 : vector<1xf32> to vector<1x1x1xf32>
      %41 = vector.extract %40[0, 0, 0] : f32 from vector<1x1x1xf32>
      %c0_31 = arith.constant 0 : index
      %c0_32 = arith.constant 0 : index
      %42 = vector.load %arg7[%c0_31, %c0_32] : memref<8x128xf32, #tpu.memory_space<vmem>>, vector<8x128xf32>
      %43 = vector.shape_cast %42 : vector<8x128xf32> to vector<1x8x128xf32>
      %cst_33 = arith.constant dense<0.000000e+00> : vector<1xf32>
      %44 = vector.multi_reduction <add>, %43, %cst_33 [1, 2] : vector<1x8x128xf32> to vector<1xf32>
      %45 = vector.shape_cast %44 : vector<1xf32> to vector<1x1x1xf32>
      %46 = vector.extract %45[0, 0, 0] : f32 from vector<1x1x1xf32>
      %c0_34 = arith.constant 0 : index
      %c0_35 = arith.constant 0 : index
      %47 = vector.load %arg8[%c0_34, %c0_35] : memref<8x128xf32, #tpu.memory_space<vmem>>, vector<8x128xf32>
      %48 = vector.shape_cast %47 : vector<8x128xf32> to vector<1x8x128xf32>
      %cst_36 = arith.constant dense<0.000000e+00> : vector<1xf32>
      %49 = vector.multi_reduction <add>, %48, %cst_36 [1, 2] : vector<1x8x128xf32> to vector<1xf32>
      %50 = vector.shape_cast %49 : vector<1xf32> to vector<1x1x1xf32>
      %51 = vector.extract %50[0, 0, 0] : f32 from vector<1x1x1xf32>
      %52 = arith.addf %46, %51 : f32
      %cst_37 = arith.constant 1.000000e+00 : f32
      %53 = arith.addf %52, %cst_37 : f32
      %cst_38 = arith.constant 2.000000e+00 : f32
      %54 = arith.mulf %cst_38, %41 : f32
      %cst_39 = arith.constant 1.000000e+00 : f32
      %55 = arith.addf %54, %cst_39 : f32
      %56 = arith.divf %55, %53 : f32
      %cst_40 = arith.constant 1.000000e+00 : f32
      %57 = arith.subf %cst_40, %56 : f32
      %58 = vector.broadcast %57 : f32 to vector<1x1x128xf32>
      %c0_41 = arith.constant 0 : index
      %c0_42 = arith.constant 0 : index
      %c0_43 = arith.constant 0 : index
      %59 = vector.load %arg5[%c0_41, %c0_42, %c0_43] : memref<1x1x128xf32, #tpu.memory_space<vmem>>, vector<1x1x128xf32>
      tpu.vector_store %arg5[%c0_41, %c0_42, %c0_43], %58 {strides = array<i32>} : memref<1x1x128xf32, #tpu.memory_space<vmem>>, vector<1x1x128xf32>,
    } else {
    }
    return
  }
  func.func @transform_0(%arg0: i32, %arg1: i32) -> (i32, i32, i32) {
    %c0_i32 = arith.constant 0 : i32
    %c0_i32_0 = arith.constant 0 : i32
    return %arg0, %arg1, %c0_i32 : i32, i32, i32
  }
  func.func @transform_1(%arg0: i32, %arg1: i32) -> (i32, i32, i32) {
    %c0_i32 = arith.constant 0 : i32
    %c0_i32_0 = arith.constant 0 : i32
    return %arg0, %arg1, %c0_i32 : i32, i32, i32
  }
  func.func @transform_2(%arg0: i32, %arg1: i32) -> (i32, i32, i32) {
    %c0_i32 = arith.constant 0 : i32
    %c0_i32_0 = arith.constant 0 : i32
    return %arg0, %arg1, %c0_i32 : i32, i32, i32
  }
  func.func @transform_3(%arg0: i32, %arg1: i32) -> (i32, i32, i32) {
    %c0_i32 = arith.constant 0 : i32
    %c0_i32_0 = arith.constant 0 : i32
    %c0_i32_1 = arith.constant 0 : i32
    return %arg0, %c0_i32, %c0_i32_0 : i32, i32, i32
  }
}

</mosaic_0001>

<bundles_post_ra>
// kernel: tpu_custom_call.1
= control target key start
LH: loop header
LB: loop body
LE: loop exit
PB: predicated region body
PF: predicated region fallthrough
CT: control target
= control target key end

     0   :  { %s954_s0 = inlined_call_operand.hbm [shape: f32[2,8,128], index: 0, kind: input, shape index: {}]   ;;  %s955_s1 = inlined_call_operand.hbm [shape: f32[2,8,128], index: 1, kind: input, shape index: {}]   ;;  %s956_s2 = inlined_call_operand.hbm [shape: f32[2,8,128], index: 2, kind: input, shape index: {}]   ;;  %s957_s3 = inlined_call_operand.hbm [shape: f32[2,1,128], index: 3, kind: output, shape index: {}]  }
   0x1   :  { %960 = sst [smem:[#allocation18_spill]] %s955_s1 }
   0x2   :  { %8 = vsyncpa [#allocation6], 0 }
   0x3   :  { %10 = vsyncpa [#allocation6 + $0x1], 0 }
   0x4   :  { %11 = vsyncpa [#allocation9], 0 }
   0x5   :  { %13 = vsyncpa [#allocation9 + $0x1], 0 }
   0x6   :  { %14 = vsyncpa [#allocation7], 0 }
   0x7   :  { %16 = vsyncpa [#allocation7 + $0x1], 0  ;;  %s801_s12 = smov 0   ;;  %s803_s13 = smov 0  }
   0x8   :  { %s805_s14 = smov 0   ;;  %s807_s15 = smov 0  }
   0x9   :  { %s809_s16 = smov 0   ;;  %s811_s17 = smov 0  }
   0xa LB: > { %961 = sst [smem:[#allocation15_spill]] %s774_s16  ;;  %s832_s18 = sadd.s32 4294967295, %s778_s17   ;;  %s778_s17 = sphi %s811_s17, %s22_s17   ;;  %s774_s16 = sphi %s809_s16, %s973_s16   ;;  %s770_s15 = sphi %s807_s15, %s972_s15   ;;  %s766_s14 = sphi %s805_s14, %s976_s14   ;;  %s762_s13 = sphi %s803_s13, %s975_s13   ;;  %s758_s12 = sphi %s801_s12, %s974_s12  }
   0xb   : > { %s503_s19 = sadd.s32 4294967294, %s778_s17   ;;  %s34_s20 = sadd.s32 1, %s774_s16 }
   0xc   : > { %s43_s21 = sadd.s32 1, %s766_s14  ;;  %p36_p0 = scmp.ge.s32.totalorder %s34_s20, 2 }
   0xd   : > { %p50_p1 = scmp.ne.s32.totalorder %s766_s14, %s762_s13  ;;  %p51_p2 = scmp.eq.s32.totalorder %s778_s17, 0 }
   0xe   : > { %p56_p3 = scmp.ne.s32.totalorder %s762_s13, %s758_s12  ;;  %s978_s20 = smov (%p36_p0, %s34_s20), 0 }
   0xf   : > { %962 = sst [smem:[#allocation16_spill]] %s978_s20  ;;  %p844_p4 = por %p51_p2, %p50_p1 }
  0x10   : > { %p57_p5 = scmp.eq.s32.totalorder %s832_s18, 0  ;;  %s38_s23 = ssub.s32 %s774_s16, %s978_s20 }
  0x11   : > { %p136_p6 = scmp.eq.s32.totalorder %s832_s18, 1  ;;  %p41_p7 = scmp.eq.s32.totalorder %s38_s23, 0 }
  0x12   : > { %p852_p8 = por %p57_p5, %p56_p3  ;;  %p142_p10 = scmp.eq.s32.totalorder %s503_s19, 1 }
  0x13   : > { %p856_p9 = por %p136_p6, %p50_p1  ;;  %p505_p12 = scmp.ge.s32.totalorder %s778_s17, 2 }
  0x14   : > { %s861_s26 = scalar_select %p41_p7, %s766_s14, %s43_s21  }
  0x15   : > { %p863_p11 = por %p142_p10, %p56_p3  ;;  %p549_p13 = scmp.lt.s32.totalorder %s778_s17, 2 }
  0x16   : > { %966 = sst [smem:[#allocation17_spill]] %s861_s26  ;;  %s162_s28 = sand.u32 1, %s766_s14  }
  0x17   : > { %s506_s29 = sshll.u32 %s162_s28, 3  ;;  %s507_s30 = sshll.u32 %s774_s16, 3 }
  0x18   : > { %p873_p0 = pnand %p549_p13, %p844_p4  ;;  %s182_s5 = sand.u32 1, %s778_s17  }
  0x19   : > { %s969_s1 = sld [smem:[#allocation18_spill]]  ;;  %s186_s10 = scalar_lea.vmem [#allocation8], %s506_s29 }
  0x1a   : > { %s195_s11 = sshll.u32 %s186_s10, 4  ;;  %s183_s19 = scalar_lea.sflag [#allocation9], %s182_s5  ;;  %s196_s11 = int_to_ptr.vmem [resolvable:$true] %s195_s11 }
  0x1b   : > { %p512_p1 = scmp.ge.s32.totalorder %s778_s17, 1  ;;  %p220_p2 = scmp.lt.s32.totalorder %s778_s17, 3 }
  0x1c   : > { %s171_s6 = scalar_lea.hbm %s954_s0, %s507_s30  ;;  %s163_s10 = scalar_lea.sflag [#allocation6], %s162_s28 }
  0x1d   : > { %p885_p3 = pnand %p512_p1, %p220_p2  ;;  %s173_s7 = sshll.u32 %s171_s6, 4  ;;  %s174_s7 = int_to_ptr.hbm [resolvable:$true] %s173_s7 }
  0x1e   : > { %s206_s16 = scalar_lea.vmem [#allocation10], %s506_s29  ;;  %s902_s22 = sand.u32 (!%p885_p3), 1, %s762_s13  }
  0x1f   : > { %s191_s8 = scalar_lea.hbm %s969_s1, %s507_s30  ;;  %s215_s26 = sshll.u32 %s206_s16, 4  ;;  %s216_s26 = int_to_ptr.vmem [resolvable:$true] %s215_s26 }
  0x20   : > { %s193_s9 = sshll.u32 %s191_s8, 4  ;;  %s166_s8 = scalar_lea.vmem [#allocation5], %s506_s29  ;;  %s194_s9 = int_to_ptr.hbm [resolvable:$true] %s193_s9 }
  0x21   : > { %541 = dma.hbm_to_vmem [thread:$0]  (!%p873_p0), %s194_s9, 128, %s196_s11, %s183_s19  }
  0x22   : > { %s175_s1 = sshll.u32 %s166_s8, 4  ;;  %s211_s11 = scalar_lea.hbm %s956_s2, %s507_s30  ;;  %s176_s1 = int_to_ptr.vmem [resolvable:$true] %s175_s1 }
  0x23   : > { %538 = dma.hbm_to_vmem [thread:$0]  (!%p873_p0), %s174_s7, 128, %s176_s1, %s163_s10  }
  0x24   : > { %s213_s20 = sshll.u32 %s211_s11, 4  ;;  %224 = sbr.rel (%p885_p3) target bundleno = 316 (0x13c), region = 32  ;;  %s214_s20 = int_to_ptr.hbm [resolvable:$true] %s213_s20 }
  0x25   : > { %544 = dma.hbm_to_vmem [thread:$0]  (!%p873_p0), %s214_s20, 128, %s216_s26, %s183_s19  }
  0x26   : > { %s513_s1 = sshll.u32 (!%p885_p3), %s902_s22, 3  ;;  %s227_s28 = scalar_lea.sflag (!%p885_p3), [#allocation6], %s902_s22 }
  0x27   : > { %s230_s23 = scalar_lea.vmem (!%p885_p3), [#allocation5], %s513_s1 }
  0x29   : > { %745 = dma.done.wait (%p852_p8), %s227_s28, 128  }
  0x2a   : > { %747 = vsyncadd (%p852_p8), %s227_s28, 4294967168  ;;  %s236_s16 = sand.u32 1, %s832_s18   ;;  %s240_s26 = scalar_lea.vmem [#allocation8], %s513_s1 }
  0x2b   : > { %s237_s20 = scalar_lea.sflag [#allocation9], %s236_s16 }
  0x2c   : > { %749 = dma.done.wait (%p852_p8), %s237_s20, 256  }
  0x2d   : > { %751 = vsyncadd (%p852_p8), %s237_s20, 4294967040  ;;  %v290_v0 = vld [vmem:[%s230_s23] sm:$0xff]  ;;  %s250_s29 = scalar_lea.vmem [#allocation10], %s513_s1  ;;  %v292_v2 = vld [vmem:[%s240_s26] sm:$0xff]  ;;  %v780_v4 = vmov 0.0   ;;  %s378_s8 = scalar_lea.hbm %s957_s3, %s770_s15 }
  0x2e   : > { %v291_v1 = vld [vmem:[%s250_s29] sm:$0xff]  ;;  %vm293_vm0 = vcmp.eq.f32.partialorder %v292_v2, 1.0  ;;  %vm294_vm1 = vcmp.gt.f32.partialorder %v290_v0, 0.0  ;;  %s282_s9 = scalar_lea.vmem [#allocation11], %s902_s22  ;;  %s382_s28 = sshll.u32 %s378_s8, 4  ;;  %s383_s28 = int_to_ptr.hbm [resolvable:$true] %s382_s28 }
  0x2f   : > { %vm295_vm2 = vmand %vm293_vm0, %vm294_vm1  ;;  %s380_s11 = sshll.u32 %s282_s9, 4  ;;  %s370_s16 = scalar_lea.sflag [#allocation7], %s902_s22  ;;  %s381_s11 = int_to_ptr.vmem [resolvable:$true] %s380_s11 }
  0x30   : > { %v298_v3 = vsel %vm295_vm2, %v291_v1, 0.0  ;;  %v516_v5 = vsel %vm295_vm2, 1.0, %v780_v4  ;;  %s706_s20 = sshra.s32 %s383_s28, 4  ;;  %s707_s20 = int_to_ptr.hbm [resolvable:$true] %s706_s20 }
  0x31   : > { %316 = vadd.xlane.f32.xlu0 %v298_v3  ;;  %336 = vadd.xlane.f32.xlu1 %v516_v5  ;;  %v304_v6 = vmul.f32 %v298_v3, %v298_v3  ;;  %s708_s26 = scalar_lea.hbm %s707_s20, 1  ;;  %p713_p7 = scmp.lt.s32.totalorder %s707_s20, %s957_s3 }
  0x32   : > { %p709_p4 = scmp.ne.s32.totalorder %s707_s20, %s708_s26 }
  0x34   : > { %p710_p5 = pnand %p709_p4, %p856_p9 }
  0x36   : > { %p711_p6 = pneg %p710_p5 }
  0x39   : > { %326 = vadd.xlane.f32.xlu0 %v304_v6 }
  0xa4   : > { %v317_v7 = vpop.xlane.xlu0 %316  ;;  %v337_v8 = vpop.xlane.xlu1 %336 }
  0xa5   : > { %v318_v9 = vrot.slane %v317_v7, 4  ;;  %v338_v10 = vrot.slane %v337_v8, 4 }
  0xa7   : > { %v319_v11 = vadd.f32 %v318_v9, %v317_v7  ;;  %v339_v12 = vadd.f32 %v338_v10, %v337_v8 }
  0xa9   : > { %v320_v13 = vrot.slane %v319_v11, 2  ;;  %v340_v15 = vrot.slane %v339_v12, 2 }
  0xab   : > { %v321_v14 = vadd.f32 %v320_v13, %v319_v11  ;;  %v341_v21 = vadd.f32 %v340_v15, %v339_v12 }
  0xac   : > { %v327_v16 = vpop.xlane.xlu0 %326 }
  0xad   : > { %v328_v17 = vrot.slane %v327_v16, 4  ;;  %v322_v18 = vrot.slane %v321_v14, 1  ;;  %v342_v24 = vrot.slane %v341_v21, 1 }
  0xaf   : > { %v329_v19 = vadd.f32 %v328_v17, %v327_v16  ;;  %v323_v20 = vadd.f32 %v322_v18, %v321_v14  ;;  %v343_v27 = vadd.f32 %v342_v24, %v341_v21 }
  0xb1   : > { %v330_v22 = vrot.slane %v329_v19, 2  ;;  %519 = vpush %v323_v20 }
  0xb3   : > { %v331_v23 = vadd.f32 %v330_v22, %v329_v19 }
  0xb5   : > { %v332_v25 = vrot.slane %v331_v23, 1 }
  0xb7   : > { %v333_v26 = vadd.f32 %v332_v25, %v331_v23 }
  0xb9   : > { %521 = vpush %v333_v26 }
  0xba   : > { %523 = vpush %v343_v27 }
  0xe2   : > { %s520_s18 = spop %519 }
  0xe3   : > { %s347_s21 = smul.f32 2.0, %s520_s18  ;;  %s712_s18 = scalar_lea.hbm %s957_s3, 2 }
  0xe4   : > { %p714_p8 = scmp.lt.s32.totalorder %s712_s18, %s708_s26 }
  0xe5   : > { %s348_s10 = sadd.f32 1.0, %s347_s21 }
  0xe6   : > { %p715_p10 = por %p714_p8, %p713_p7 }
  0xe8   : > { %p716_p13 = pnand %p715_p10, %p711_p6 }
  0xea   : > { %s522_s24 = spop %521 }
  0xeb   : > { %s524_s30 = spop %523 }
  0xec   : > { %s345_s4 = sadd.f32 %s524_s30, %s522_s24 }
  0xee   : > { %s346_s19 = sadd.f32 1.0, %s345_s4 }
  0xf0   : > { %v349_v28 = vstv %s346_s19 }
  0xf1   : > { %600 = vrcp.f32 %v349_v28  ;;  %v361_v32 = vand.u32 2147483648, %v349_v28  ;;  %v359_v34 = vand.u32 2147483647, %v349_v28  ;;  %vm355_vm4 = vweird.f32 %v349_v28 }
  0xf3   : > { %v362_v36 = vor.u32 1.1754944e-38, %v361_v32  ;;  %vm360_vm6 = vcmp.eq.f32.partialorder %v359_v34, 8.507059e+37 }
  0xf7   : > { %v601_v29 = vpop.eup %600 }
  0xf8   : > { %v351_v30 = vmul.f32 %v601_v29, %v349_v28  ;;  %vm356_vm3 = vweird.f32 %v601_v29 }
  0xf9   : > { %vm357_vm5 = vmor %vm355_vm4, %vm356_vm3 }
  0xfa   : > { %v352_v31 = vsub.f32 1.0, %v351_v30 }
  0xfc   : > { %v353_v33 = vmul.f32 %v601_v29, %v352_v31 }
  0xfe   : > { %v354_v35 = vadd.f32 %v601_v29, %v353_v33 }
 0x100   : > { %v358_v37 = vsel %vm357_vm5, %v601_v29, %v354_v35 }
 0x101   : > { %v363_v38 = vsel %vm360_vm6, %v362_v36, %v358_v37 }
 0x102   : > { %525 = vpush %v363_v38 }
 0x133   : > { %s526_s5 = spop %525 }
 0x134   : > { %s365_s1 = smul.f32 %s526_s5, %s348_s10 }
 0x136   : > { %s366_s23 = ssub.f32 1.0, %s365_s1 }
 0x138   : > { %v367_v39 = vstv %s366_s23 }
 0x139   : > { %368 = vst [vmem:[%s282_s9] sm:$0x1] %v367_v39 }
 0x13a   : > { %719 = shalt.err (!%p716_p13)
}
 0x13b   : > { %533 = dma.vmem_to_hbm [thread:$0]  (%p856_p9), %s381_s11, 16, %s383_s28, %s370_s16  }
 0x13c PF: > { %s394_s22 = sand.u32 1, %s758_s12   ;;  %p546_p0 = pnand %p505_p12, %p863_p11 }
 0x13d   : > { %s395_s4 = scalar_lea.sflag [#allocation7], %s394_s22 }
 0x13e   : > { %p547_p1 = pneg %p546_p0 }
 0x140   : > { %753 = dma.done.wait (%p547_p1), %s395_s4, 16  }
 0x141   : > { %755 = vsyncadd (%p547_p1), %s395_s4, 4294967280  ;;  %s22_s17 = sadd.s32 1, %s778_s17   ;;  %s971_s19 = sld [smem:[#allocation17_spill]] }
 0x142   : > { %p19_p2 = scmp.ge.s32.totalorder %s22_s17, 4   ;;  %s972_s15 = sld [smem:[#allocation15_spill]] }
 0x143   : > { %s973_s16 = sld [smem:[#allocation16_spill]]  ;;  %s974_s12 = smov %s762_s13 }
 0x144   : > { %s975_s13 = smov %s766_s14  ;;  %21 = sbr.rel (!%p19_p2) target bundleno = 10 (0xa), region = 109 }
 0x147   : > { %s976_s14 = smov %s971_s19 }
 0x149   :  { %400 = vsyncpa [#allocation6], 1 }
 0x14a   :  { %402 = vsyncpa [#allocation6 + $0x1], 1 }
 0x14b   :  { %403 = vsyncpa [#allocation9], 1 }
 0x14c   :  { %405 = vsyncpa [#allocation9 + $0x1], 1 }
 0x14d   :  { %406 = vsyncpa [#allocation7], 1 }
 0x14e   :  { %408 = vsyncpa [#allocation7 + $0x1], 1 }

</bundles_post_ra>
